<compile_context>
chip_gen: v6e
topology: v6e:2x2x1
jax: 0.10.0
libtpu: 0.0.40
codegen_flags: <defaults>
</compile_context>

<pallas_src>
import jax
import jax.numpy as jnp
from jax.experimental import pallas as pl
from jax.experimental.pallas import tpu as pltpu


def _round_up(x: int, m: int) -> int:
    return ((x + m - 1) // m) * m


def _vmem_capacity_bytes() -> int:
    try:
        return int(pltpu.get_tpu_info().vmem_capacity_bytes)
    except Exception:
        return 64 << 20  # conservative default: v7x per-TensorCore VMEM


def _resident_spec(shape, index_map):
    # Constant-index operands (weights / bias): single-buffer them so the
    # pipeline does not reserve a useless second VMEM copy.
    try:
        return pl.BlockSpec(shape, index_map, pipeline_mode=pl.Buffered(1))
    except (TypeError, AttributeError):  # older jax without pipeline_mode
        return pl.BlockSpec(shape, index_map)


def pack_meta_loss_params(w_re, w_im, b_re, b_im, *, compute_dtype=jnp.bfloat16):
    """Pre-pack the complex Linear parameters ONCE (outside the hot path).

    Returns (w_top, w_bot, b_packed):
      w_top    = [ w_re | w_im ]  (D_in, Np)  in compute_dtype
      w_bot    = [-w_im | w_re ]  (D_in, Np)  in compute_dtype
      b_packed = [ b_re | b_im ]  (1,   Np)   kept in f32
    with the N axis zero-padded to a multiple of 128 (lane alignment).  The
    zero lanes are mathematically inert in the sum-of-squares.
    """
    D_in, H = w_re.shape
    N = 2 * H
    Np = _round_up(N, 128)
    w_top = jnp.concatenate([w_re, w_im], axis=1)
    w_bot = jnp.concatenate([-w_im, w_re], axis=1)
    b_p = jnp.concatenate([b_re.reshape(1, H), b_im.reshape(1, H)], axis=1)
    pad = Np - N
    if pad:
        w_top = jnp.pad(w_top, ((0, 0), (0, pad)))
        w_bot = jnp.pad(w_bot, ((0, 0), (0, pad)))
        b_p = jnp.pad(b_p, ((0, 0), (0, pad)))
    return (w_top.astype(compute_dtype),
            w_bot.astype(compute_dtype),
            b_p.astype(jnp.float32))


def _metaloss_kernel(xr_ref, xi_ref, wt_ref, wb_ref, b_ref, o_ref):
    # Two MXU matmuls (same total MXU cycles as one K=2*D_in matmul), f32 acc.
    y = jnp.dot(xr_ref[...], wt_ref[...], preferred_element_type=jnp.float32)
    y = y + jnp.dot(xi_ref[...], wb_ref[...], preferred_element_type=jnp.float32)
    y = y + b_ref[...]  # f32 bias broadcast over the batch tile (VPU)
    # |z|^2 = re^2 + im^2; zero-padded N lanes contribute exactly 0.
    # NOTE: (tb, 1) output blocks are kept (contiguous, tiny writeback DMA);
    # a lane-dense (1, tb) layout would need a sublane->lane relayout for a
    # negligible store-side win at these output sizes.
    o_ref[...] = jnp.sum(y * y, axis=-1, keepdims=True)


def meta_loss(x_re, x_im, w_top, w_bot, b_packed, *, batch_tile=None):
    """x_*: (B, D_in); packed params from pack_meta_loss_params -> (B, 1) f32."""
    B, D_in = x_re.shape
    Dw, Np = w_top.shape
    assert x_im.shape == (B, D_in) and Dw == D_in
    assert w_bot.shape == (D_in, Np) and b_packed.shape == (1, Np)

    compute_dtype = w_top.dtype
    # No-op if the caller already produces compute_dtype (ideal for bf16).
    x_re = x_re.astype(compute_dtype)
    x_im = x_im.astype(compute_dtype)

    itemsize = jnp.dtype(compute_dtype).itemsize
    align = 16 if itemsize < 4 else 8  # bf16 sublane packing -> 16-row tiles

    # Only pad the batch when it is not sublane-aligned; non-divisible grid
    # edges are otherwise handled by Pallas, so no full padded copy of x.
    B_eff = _round_up(B, align)
    if B_eff != B:
        x_re = jnp.pad(x_re, ((0, B_eff - B), (0, 0)))
        x_im = jnp.pad(x_im, ((0, B_eff - B), (0, 0)))

    vmem_cap = _vmem_capacity_bytes()
    if batch_tile is None:
        batch_tile = 1024 if vmem_cap > (96 << 20) else 512  # v5e/v6e vs v7x

    tb = min(_round_up(batch_tile, align), B_eff)
    # v7x megacore: make sure the batch-parallel axis has >= 2 grid steps.
    if B_eff >= 2 * align and pl.cdiv(B_eff, tb) < 2:
        tb = _round_up(pl.cdiv(B_eff, 2), align)

    # VMEM budget: double-buffered x tiles + single-buffered weights/bias +
    # f32 epilogue intermediates; shrink tb until it fits ~75% of physical.
    w_bytes = 2 * D_in * Np * itemsize + Np * 4

    def _x_bytes(t):
        return (2 * 2 * t * D_in * itemsize  # x_re / x_im, double-buffered
                + 2 * t * 4                  # (tb, 1) f32 output, double-buffered
                + 2 * t * Np * 4)            # f32 y / y*y intermediates

    target = int(vmem_cap * 0.75)
    avail = max(target - w_bytes, 2 << 20)
    while tb > align and _x_bytes(tb) > avail:
        tb = max(align, _round_up(tb // 2, align))

    vmem_limit = int(min(max(w_bytes + _x_bytes(tb) + (4 << 20), 16 << 20),
                         vmem_cap - (8 << 20)))

    grid = (pl.cdiv(B_eff, tb),)
    out = pl.pallas_call(
        _metaloss_kernel,
        out_shape=jax.ShapeDtypeStruct((B_eff, 1), jnp.float32),
        grid=grid,
        in_specs=[
            pl.BlockSpec((tb, D_in), lambda i: (i, 0)),    # x_re: pipelined
            pl.BlockSpec((tb, D_in), lambda i: (i, 0)),    # x_im: pipelined
            _resident_spec((D_in, Np), lambda i: (0, 0)),  # packed W (top)
            _resident_spec((D_in, Np), lambda i: (0, 0)),  # packed W (bottom)
            _resident_spec((1, Np), lambda i: (0, 0)),     # packed bias (f32)
        ],
        out_specs=pl.BlockSpec((tb, 1), lambda i: (i, 0)),
        compiler_params=pltpu.CompilerParams(
            dimension_semantics=("parallel",),  # v7x: shard batch across TCs
            vmem_limit_bytes=vmem_limit,
        ),
    )(x_re, x_im, w_top, w_bot, b_packed)
    return out[:B]


if __name__ == "__main__":
    B, INPUT_LEN, HIDDEN = 8, 32, 32

    key = jax.random.PRNGKey(0)
    kxr, kxi, kwr, kwi, kbr, kbi, kx2r, kx2i = jax.random.split(key, 8)

    # Deterministic synthetic parameters (Linear-style uniform scale).
    bound = 1.0 / (INPUT_LEN ** 0.5)
    w_re = jax.random.uniform(kwr, (INPUT_LEN, HIDDEN), jnp.float32, -bound, bound)
    w_im = jax.random.uniform(kwi, (INPUT_LEN, HIDDEN), jnp.float32, -bound, bound)
    b_re = jax.random.uniform(kbr, (1, HIDDEN), jnp.float32, -bound, bound)
    b_im = jax.random.uniform(kbi, (1, HIDDEN), jnp.float32, -bound, bound)

    # Complex input X split into real/imag planes.
    x_re = jax.random.normal(kxr, (B, INPUT_LEN), jnp.float32)
    x_im = jax.random.normal(kxi, (B, INPUT_LEN), jnp.float32)

    def complex_ref(xr, xi, wr, wi, br, bi):
        xc = xr + 1j * xi
        wc = wr + 1j * wi
        bc = (br + 1j * bi)[0]
        yc = xc @ wc + bc
        return jnp.sum(jnp.abs(yc) ** 2, axis=-1, keepdims=True).astype(jnp.float32)

    loss_fn = jax.jit(meta_loss)

    # --- exact path (f32 operands): matches the PyTorch cfloat module ---
    packed_f32 = pack_meta_loss_params(w_re, w_im, b_re, b_im,
                                       compute_dtype=jnp.float32)
    out_f32 = jax.block_until_ready(loss_fn(x_re, x_im, *packed_f32))
    ref = complex_ref(x_re, x_im, w_re, w_im, b_re, b_im)
    assert out_f32.shape == (B, 1), out_f32.shape
    assert jnp.allclose(out_f32, ref, rtol=1e-4, atol=1e-4), (out_f32, ref)

    # --- fast path (bf16 operands, f32 accumulate), larger batch that
    #     exercises the multi-step batch-parallel grid ---
    B2 = 64
    x2_re = jax.random.normal(kx2r, (B2, INPUT_LEN), jnp.float32)
    x2_im = jax.random.normal(kx2i, (B2, INPUT_LEN), jnp.float32)
    packed_bf16 = pack_meta_loss_params(w_re, w_im, b_re, b_im,
                                        compute_dtype=jnp.bfloat16)
    out_bf16 = jax.block_until_ready(loss_fn(x2_re, x2_im, *packed_bf16))

    rd = lambda a: a.astype(jnp.bfloat16).astype(jnp.float32)  # bf16-rounded ops
    ref_bf16 = complex_ref(rd(x2_re), rd(x2_im), rd(w_re), rd(w_im), b_re, b_im)
    assert out_bf16.shape == (B2, 1), out_bf16.shape
    assert jnp.allclose(out_bf16, ref_bf16, rtol=1e-2, atol=1e-2), (out_bf16, ref_bf16)

    print("KERNEL_OK")
</pallas_src>

<mosaic_0001>
module attributes {stable_mosaic.version = 11 : i64} {
  func.func @_metaloss_kernel(%arg0: i32, %arg1: memref<8x32xf32, #tpu.memory_space<vmem>>, %arg2: memref<8x32xf32, #tpu.memory_space<vmem>>, %arg3: memref<32x128xf32, #tpu.memory_space<vmem>>, %arg4: memref<32x128xf32, #tpu.memory_space<vmem>>, %arg5: memref<1x128xf32, #tpu.memory_space<vmem>>, %arg6: memref<8x1xf32, #tpu.memory_space<vmem>>) attributes {dimension_semantics = [#tpu.dimension_semantics<parallel>], iteration_bounds = array<i64: 1>, scalar_prefetch = 0 : i64, scratch_operands = 0 : i64, tpu.core_type = #tpu.core_type<tc>, window_params = [{transform_indices = @transform_0, window_bounds = array<i64: 8, 32>}, {transform_indices = @transform_1, window_bounds = array<i64: 8, 32>}, {pipeline_mode = #tpu.pipeline_mode<synchronous>, transform_indices = @transform_2, window_bounds = array<i64: 32, 128>}, {pipeline_mode = #tpu.pipeline_mode<synchronous>, transform_indices = @transform_3, window_bounds = array<i64: 32, 128>}, {pipeline_mode = #tpu.pipeline_mode<synchronous>, transform_indices = @transform_4, window_bounds = array<i64: 1, 128>}, {transform_indices = @transform_5, window_bounds = array<i64: 8, 1>}]} {
    %c0 = arith.constant 0 : index
    %c0_0 = arith.constant 0 : index
    %0 = vector.load %arg1[%c0, %c0_0] : memref<8x32xf32, #tpu.memory_space<vmem>>, vector<8x32xf32>
    %c0_1 = arith.constant 0 : index
    %c0_2 = arith.constant 0 : index
    %1 = vector.load %arg3[%c0_1, %c0_2] : memref<32x128xf32, #tpu.memory_space<vmem>>, vector<32x128xf32>
    %cst = arith.constant dense<0.000000e+00> : vector<8x128xf32>
    %2 = tpu.matmul %0, %1, %cst {dimension_numbers = #tpu.dot_dimension_numbers<[1], [0], [0], [1], [0, 0, 1, 1], [], []>} : vector<8x32xf32>, vector<32x128xf32>, vector<8x128xf32> -> vector<8x128xf32>
    %c0_3 = arith.constant 0 : index
    %c0_4 = arith.constant 0 : index
    %3 = vector.load %arg2[%c0_3, %c0_4] : memref<8x32xf32, #tpu.memory_space<vmem>>, vector<8x32xf32>
    %c0_5 = arith.constant 0 : index
    %c0_6 = arith.constant 0 : index
    %4 = vector.load %arg4[%c0_5, %c0_6] : memref<32x128xf32, #tpu.memory_space<vmem>>, vector<32x128xf32>
    %cst_7 = arith.constant dense<0.000000e+00> : vector<8x128xf32>
    %5 = tpu.matmul %3, %4, %cst_7 {dimension_numbers = #tpu.dot_dimension_numbers<[1], [0], [0], [1], [0, 0, 1, 1], [], []>} : vector<8x32xf32>, vector<32x128xf32>, vector<8x128xf32> -> vector<8x128xf32>
    %6 = arith.addf %2, %5 : vector<8x128xf32>
    %c0_8 = arith.constant 0 : index
    %c0_9 = arith.constant 0 : index
    %7 = vector.load %arg5[%c0_8, %c0_9] : memref<1x128xf32, #tpu.memory_space<vmem>>, vector<1x128xf32>
    %8 = vector.broadcast %7 : vector<1x128xf32> to vector<8x128xf32>
    %9 = arith.addf %6, %8 : vector<8x128xf32>
    %10 = arith.mulf %9, %9 : vector<8x128xf32>
    %cst_10 = arith.constant dense<0.000000e+00> : vector<8xf32>
    %11 = vector.multi_reduction <add>, %10, %cst_10 [1] : vector<8x128xf32> to vector<8xf32>
    %12 = vector.shape_cast %11 : vector<8xf32> to vector<8x1xf32>
    %c0_11 = arith.constant 0 : index
    %c0_12 = arith.constant 0 : index
    %13 = vector.load %arg6[%c0_11, %c0_12] : memref<8x1xf32, #tpu.memory_space<vmem>>, vector<8x1xf32>
    tpu.vector_store %arg6[%c0_11, %c0_12], %12 {strides = array<i32>} : memref<8x1xf32, #tpu.memory_space<vmem>>, vector<8x1xf32>,
    return
  }
  func.func @transform_0(%arg0: i32) -> (i32, i32) {
    %c0_i32 = arith.constant 0 : i32
    %c0_i32_0 = arith.constant 0 : i32
    return %arg0, %c0_i32 : i32, i32
  }
  func.func @transform_1(%arg0: i32) -> (i32, i32) {
    %c0_i32 = arith.constant 0 : i32
    %c0_i32_0 = arith.constant 0 : i32
    return %arg0, %c0_i32 : i32, i32
  }
  func.func @transform_2(%arg0: i32) -> (i32, i32) {
    %c0_i32 = arith.constant 0 : i32
    %c0_i32_0 = arith.constant 0 : i32
    %c0_i32_1 = arith.constant 0 : i32
    return %c0_i32, %c0_i32_0 : i32, i32
  }
  func.func @transform_3(%arg0: i32) -> (i32, i32) {
    %c0_i32 = arith.constant 0 : i32
    %c0_i32_0 = arith.constant 0 : i32
    %c0_i32_1 = arith.constant 0 : i32
    return %c0_i32, %c0_i32_0 : i32, i32
  }
  func.func @transform_4(%arg0: i32) -> (i32, i32) {
    %c0_i32 = arith.constant 0 : i32
    %c0_i32_0 = arith.constant 0 : i32
    %c0_i32_1 = arith.constant 0 : i32
    return %c0_i32, %c0_i32_0 : i32, i32
  }
  func.func @transform_5(%arg0: i32) -> (i32, i32) {
    %c0_i32 = arith.constant 0 : i32
    %c0_i32_0 = arith.constant 0 : i32
    return %arg0, %c0_i32 : i32, i32
  }
}

</mosaic_0001>

<bundles_post_ra>
// kernel: meta_loss.1
= control target key start
LH: loop header
LB: loop body
LE: loop exit
PB: predicated region body
PF: predicated region fallthrough
CT: control target
= control target key end

     0   :  { %10 = vsyncpa [#allocation3], 0  ;;  %s433_s0 = inlined_call_operand.hbm [shape: f32[8,32], index: 0, kind: input, shape index: {}]   ;;  %s434_s1 = inlined_call_operand.hbm [shape: f32[8,32], index: 1, kind: input, shape index: {}]   ;;  %s435_s2 = inlined_call_operand.hbm [shape: f32[32,128], index: 2, kind: input, shape index: {}]   ;;  %s436_s3 = inlined_call_operand.hbm [shape: f32[32,128], index: 3, kind: input, shape index: {}]   ;;  %s437_s4 = inlined_call_operand.vmem [shape: f32[1,128], index: 4, kind: input, shape index: {}]   ;;  %s438_s5 = inlined_call_operand.vmem [shape: f32[8,1], index: 5, kind: output, shape index: {}]  }
   0x1   :  { %11 = vsyncpa [#allocation5], 0 }
   0x2   :  { %12 = vsyncpa [#allocation8], 0  ;;  %s377_s18 = smov [#allocation4]   ;;  %s378_s20 = smov [#allocation2]  }
   0x3   :  { %s29_s19 = sshll.u32 %s377_s18, 4  ;;  %s19_s21 = sshll.u32 %s378_s20, 4  ;;  %s30_s19 = int_to_ptr.vmem [resolvable:$true] %s29_s19  ;;  %s20_s21 = int_to_ptr.vmem [resolvable:$true] %s19_s21 }
   0x4   :  { %s299_s22 = scalar_lea.vmem %s30_s19, 128  ;;  %p304_p1 = scmp.lt.s32.totalorder %s30_s19, %s30_s19 }
   0x5   :  { %p300_p0 = scmp.ne.s32.totalorder %s30_s19, %s299_s22  ;;  %p305_p2 = scmp.lt.s32.totalorder %s299_s22, %s299_s22 }
   0x7   :  { %p306_p3 = por %p305_p2, %p304_p1 }
   0x9   :  { %p307_p4 = pnand %p306_p3, %p300_p0 }
   0xb   :  { %310 = shalt.err (!%p307_p4)
}
   0xc   :  { %32 = dma.hbm_to_vmem [thread:$0]  %s434_s1, 128, %s30_s19, [#allocation5]  }
   0xd   :  { %s319_s25 = scalar_lea.vmem %s20_s21, 128  ;;  %p324_p6 = scmp.lt.s32.totalorder %s20_s21, %s20_s21 }
   0xe   :  { %p320_p5 = scmp.ne.s32.totalorder %s20_s21, %s319_s25  ;;  %p325_p7 = scmp.lt.s32.totalorder %s319_s25, %s319_s25 }
  0x10   :  { %p326_p8 = por %p325_p7, %p324_p6 }
  0x12   :  { %p327_p9 = pnand %p326_p8, %p320_p5 }
  0x14   :  { %330 = shalt.err (!%p327_p9)
}
  0x15   :  { %22 = dma.hbm_to_vmem [thread:$0]  %s433_s0, 128, %s20_s21, [#allocation3]  }
  0x16   :  { %s379_s28 = smov [#allocation6]  }
  0x17   :  { %s38_s29 = sshll.u32 %s379_s28, 4  ;;  %s39_s29 = int_to_ptr.vmem [resolvable:$true] %s38_s29 }
  0x18   :  { %s339_s30 = scalar_lea.vmem %s39_s29, 512  ;;  %p344_p11 = scmp.lt.s32.totalorder %s39_s29, %s39_s29 }
  0x19   :  { %p340_p10 = scmp.ne.s32.totalorder %s39_s29, %s339_s30  ;;  %p345_p12 = scmp.lt.s32.totalorder %s339_s30, %s339_s30 }
  0x1b   :  { %p346_p13 = por %p345_p12, %p344_p11 }
  0x1d   :  { %p347_p0 = pnand %p346_p13, %p340_p10 }
  0x1f   :  { %350 = shalt.err (!%p347_p0)
}
  0x20   :  { %s380_s1 = smov 128   ;;  %s381_s6 = smov 8  }
  0x21   :  { %44 = dma.hbm_to_vmem [thread:$0]  %s435_s2, 512, %s39_s29, [#allocation5], %s380_s1, %s380_s1, %s381_s6  }
  0x22   :  { %s382_s9 = smov [#allocation7]  }
  0x23   :  { %s50_s10 = sshll.u32 %s382_s9, 4  ;;  %s51_s10 = int_to_ptr.vmem [resolvable:$true] %s50_s10 }
  0x24   :  { %s359_s0 = scalar_lea.vmem %s51_s10, 512  ;;  %p364_p2 = scmp.lt.s32.totalorder %s51_s10, %s51_s10 }
  0x25   :  { %p360_p1 = scmp.ne.s32.totalorder %s51_s10, %s359_s0  ;;  %p365_p3 = scmp.lt.s32.totalorder %s359_s0, %s359_s0 }
  0x27   :  { %p366_p4 = por %p365_p3, %p364_p2 }
  0x29   :  { %p367_p5 = pnand %p366_p4, %p360_p1 }
  0x2b   :  { %370 = shalt.err (!%p367_p5)
}
  0x2c   :  { %56 = dma.hbm_to_vmem [thread:$0]  %s436_s3, 512, %s51_s10, [#allocation8], %s380_s1, %s380_s1, %s381_s6  }
  0x2d   :  { %371 = dma.done.wait [#allocation3], 128  }
  0x2e   :  { %372 = vsyncadd [#allocation3], 4294967168 }
  0x2f   :  { %373 = dma.done.wait [#allocation5], 640  }
  0x30   :  { %374 = vsyncadd [#allocation5], 4294966656 }
  0x31   :  { %375 = dma.done.wait [#allocation8], 512  }
  0x32   :  { %376 = vsyncadd [#allocation8], 4294966784  ;;  %v383_v0 = vmov 0.0   ;;  %vm384_vm0 = vmmov 0   ;;  %v80_v1 = vld [vmem:[#allocation7 + $0x18] sm:$0xff]  ;;  %v79_v3 = vld [vmem:[#allocation7 + $0x10] sm:$0xff] }
  0x33   :  { %261 = vmatprep.subr.mxu0 %v383_v0  ;;  %272 = vmatprep.subr.mxu1 %v383_v0  ;;  %v75_v2 = vld [vmem:[#allocation6 + $0x18] sm:$0xff]  ;;  %v74_v4 = vld [vmem:[#allocation6 + $0x10] sm:$0xff]  ;;  %v78_v5 = vld [vmem:[#allocation7 + $0x8] sm:$0xff]  ;;  %vm81_vm1 = vcmask 261120   ;;  %vm239_vm2 = vcmask 7168  }
  0x34   :  { %269 = vmatprep.mubr.msk.f32.mxu0 %vm384_vm0, %v383_v0  ;;  %280 = vmatprep.mubr.msk.f32.mxu1 %vm384_vm0, %v383_v0  ;;  %v73_v6 = vld [vmem:[#allocation6 + $0x8] sm:$0xff]  ;;  %v77_v7 = vld [vmem:[#allocation7] sm:$0xff]  ;;  %v76_v9 = vld [vmem:[#allocation4] sm:$0xff] }
  0x35   :  { %262 = vmatpush3.msra.mxu0 %v80_v1  ;;  %273 = vmatpush3.msra.mxu1 %v75_v2  ;;  %v72_v8 = vld [vmem:[#allocation6] sm:$0xff]  ;;  %v71_v10 = vld [vmem:[#allocation2] sm:$0xff] }
  0x36   :  { %263 = vmatprep.subr.mxu0 %v383_v0  ;;  %274 = vmatprep.subr.mxu1 %v383_v0  ;;  %v250_v13 = vld [vmem:[%s437_s4] ss:$0 sm:$0xff] }
  0x37   :  { %264 = vmatpush3.msra.mxu0 %v79_v3  ;;  %275 = vmatpush3.msra.mxu1 %v74_v4 }
  0x38   :  { %265 = vmatprep.subr.mxu0 %v383_v0  ;;  %276 = vmatprep.subr.mxu1 %v383_v0 }
  0x39   :  { %266 = vmatpush3.msra.mxu0 %v78_v5  ;;  %277 = vmatpush3.msra.mxu1 %v73_v6 }
  0x3a   :  { %267 = vmatprep.subr.mxu0 %v383_v0  ;;  %278 = vmatprep.subr.mxu1 %v383_v0 }
  0x3b   :  { %268 = vmatpush3.msra.mxu0 %v77_v7  ;;  %279 = vmatpush3.msra.mxu1 %v72_v8 }
  0x3c   :  { %270 = vmatmul.mubr.msk.f32.vlgmr.msra.gmra.mxu0 %vm81_vm1, %v76_v9  ;;  %281 = vmatmul.mubr.msk.f32.vlgmr.msra.gmra.mxu1 %vm81_vm1, %v71_v10 }
  0xfc   :  { %v151_v11 = vpop.f32.mrf.mxu0  ;;  %v224_v12 = vpop.f32.mrf.mxu1 }
  0xfd   :  { %v225_v14 = vadd.f32 %v224_v12, %v151_v11 }
  0xfe   :  { %v271_v15 = vpop.f32.mrf.mxu0  ;;  %v282_v16 = vpop.f32.mrf.mxu1 }
  0xff   :  { %v235_v17 = vadd.f32 %v250_v13, %v225_v14 }
 0x101   :  { %v236_v18 = vmul.f32 %v235_v17, %v235_v17 }
 0x103   :  { %237 = vadd.xlane.f32.xlu0 %v236_v18 }
 0x18c   :  { %v238_v19 = vpop.xlane.xlu0 %237 }
 0x18d   :  { %240 = vst.msk [vmem:[%s438_s5] sm:$0xff] %vm239_vm2, %v238_v19 }
 0x18e   :  { %245 = vsyncpa [#allocation3], 1 }
 0x18f   :  { %246 = vsyncpa [#allocation5], 1 }
 0x190   :  { %247 = vsyncpa [#allocation8], 1 }

</bundles_post_ra>
